<compile_context>
chip_gen: v7x
topology: tpu7x:2x2x1
jax: 0.10.0
libtpu: 0.0.40
codegen_flags: <defaults>
</compile_context>

<pallas_src>
import functools

import jax
import jax.numpy as jnp
from jax.experimental import pallas as pl
from jax.experimental.pallas import tpu as pltpu


def _round_up(x, m):
    return ((x + m - 1) // m) * m


def _vmem_capacity_bytes():
    """Per-core physical VMEM; falls back to the smallest generation (v7x, 64 MiB)."""
    try:
        return int(pltpu.get_tpu_info().vmem_capacity_bytes)
    except Exception:  # pragma: no cover - defensive fallback
        return 64 * 1024 * 1024


def _min_sublane(itemsize):
    # Minimum second-minor tile: f32 -> 8, bf16 -> 16, int8/fp8 -> 32.
    return {4: 8, 2: 16, 1: 32}.get(int(itemsize), 8)


# ---------------------------------------------------------------------------
# Path 1: embedding table resident in VMEM, in-kernel row gather.
# ---------------------------------------------------------------------------
def _embed_resident_kernel(ids_ref, table_ref, out_ref, *, unroll):
    # ids_ref:   (n_pad,) int32 in SMEM (scalar prefetch)
    # table_ref: (V, D) in VMEM; constant block index -> DMA'd once, resident
    # out_ref:   (tb, D) output block in VMEM
    tb = out_ref.shape[0]
    base = pl.program_id(0) * tb

    @pl.loop(0, tb // unroll)
    def _(c):
        t0 = c * unroll
        # Static inner unroll: `unroll` independent row copies per iteration so
        # the SMEM-scalar-read -> dynamic row load -> row store chains co-issue
        # instead of serializing behind loop overhead.
        for u in range(unroll):
            t = t0 + u
            idx = ids_ref[base + t]
            out_ref[pl.ds(t, 1), :] = table_ref[pl.ds(idx, 1), :]


# ---------------------------------------------------------------------------
# Path 2: table stays in HBM, per-row DMAs gather straight into the out block.
# ---------------------------------------------------------------------------
def _embed_dma_gather_kernel(ids_ref, table_hbm_ref, out_ref, sem, *, unroll):
    # ids_ref:       (n_pad,) int32 in SMEM (scalar prefetch)
    # table_hbm_ref: (V, D) left in HBM (memory_space=pl.ANY)
    # out_ref:       (tb, D) output block in VMEM (DMA destination)
    tb = out_ref.shape[0]
    base = pl.program_id(0) * tb

    # Issue one row-sized HBM->VMEM copy per token, directly into out_ref
    # (no intermediate VMEM slab). All copies run concurrently on the DMA
    # engine; Pallas's double-buffered output writeback overlaps the next
    # grid step's gather, so there is nothing left in-body to pipeline against.
    @pl.loop(0, tb // unroll)
    def _(c):
        t0 = c * unroll
        for u in range(unroll):
            t = t0 + u
            idx = ids_ref[base + t]
            pltpu.make_async_copy(
                table_hbm_ref.at[pl.ds(idx, 1), :],
                out_ref.at[pl.ds(t, 1), :],
                sem.at[0],
            ).start()

    # Wait for all copies. NOTE: correctness relies on every copy above having
    # the identical byte size (exactly one table row), so `tb` waits with a
    # same-sized dummy descriptor on the shared semaphore drain all signals.
    @pl.loop(0, tb)
    def _(t):
        pltpu.make_async_copy(
            table_hbm_ref.at[pl.ds(0, 1), :],
            out_ref.at[pl.ds(t, 1), :],
            sem.at[0],
        ).wait()


def embedder_forward(x_ids, embed_table, *, tok_block=None, force_dma_gather=False):
    """Pallas equivalent of Embedder.forward: embed_table[x_ids]."""
    V, D = embed_table.shape
    lead_shape = x_ids.shape
    N = 1
    for s in lead_shape:
        N *= int(s)
    itemsize = embed_table.dtype.itemsize
    row_bytes = D * itemsize
    min_sub = _min_sublane(itemsize)

    # --- Token block: lane/sublane-dense (tb, D) output blocks of ~1 MiB so
    # per-grid-step overhead (~0.35 us) is amortized; scaled with D, clipped to
    # [min_sublane .. 1024] and to the (padded) token count.
    if tok_block is None:
        tb = max(128, (1 << 20) // max(row_bytes, 1))
    else:
        tb = int(tok_block)
    tb = max(min_sub, min(_round_up(tb, min_sub), 1024))
    tb = min(tb, _round_up(N, min_sub))
    tb = _round_up(tb, min_sub)

    num_blocks = (N + tb - 1) // tb
    n_pad = num_blocks * tb

    # ids: clamp (PyTorch raises on OOB; TPU OOB access is unchecked, so
    # clamping is the safe equivalent) and pad so every SMEM read is in-bounds.
    # Only the tiny int32 id vector is padded -- the (N, D) output is not, the
    # final partial block is handled by Pallas's masked writeback.
    flat_ids = jnp.clip(x_ids.reshape(N).astype(jnp.int32), 0, V - 1)
    if n_pad != N:
        flat_ids = jnp.concatenate(
            [flat_ids, jnp.zeros((n_pad - N,), jnp.int32)])

    out_block_bytes = tb * row_bytes
    table_bytes = V * row_bytes
    vmem_cap = _vmem_capacity_bytes()

    # Budget 2x the table (Pallas may still double-buffer the constant-index
    # block) + double-buffered output blocks + headroom; go resident only if
    # that fits comfortably in this generation's VMEM.
    resident_budget = 2 * table_bytes + 2 * out_block_bytes + (2 << 20)
    use_resident = (not force_dma_gather) and resident_budget <= int(0.75 * vmem_cap)

    unroll = 8 if tb % 8 == 0 else 1  # tb is always a multiple of 8 here

    if use_resident:
        cost = pl.CostEstimate(
            flops=0,
            transcendentals=0,
            bytes_accessed=table_bytes + n_pad * row_bytes + n_pad * 4,
        )
        vmem_limit = int(min(max(resident_budget, 16 << 20), int(0.9 * vmem_cap)))
        out_flat = pl.pallas_call(
            functools.partial(_embed_resident_kernel, unroll=unroll),
            out_shape=jax.ShapeDtypeStruct((N, D), embed_table.dtype),
            grid_spec=pltpu.PrefetchScalarGridSpec(
                num_scalar_prefetch=1,
                grid=(num_blocks,),
                in_specs=[
                    # Constant block index -> table DMA'd once, kept resident.
                    pl.BlockSpec((V, D), lambda i, ids: (0, 0)),
                ],
                out_specs=pl.BlockSpec((tb, D), lambda i, ids: (i, 0)),
            ),
            compiler_params=pltpu.CompilerParams(
                # Disjoint output blocks per step: shard across TCs on v7x.
                dimension_semantics=("parallel",),
                vmem_limit_bytes=vmem_limit,
            ),
            cost_estimate=cost,
        )(flat_ids, embed_table)
    else:
        cost = pl.CostEstimate(
            flops=0,
            transcendentals=0,
            # Pure gather: read + write one row per token, plus the ids.
            bytes_accessed=2 * n_pad * row_bytes + n_pad * 4,
        )
        vmem_limit = int(min(max(4 * out_block_bytes + (2 << 20), 16 << 20),
                             int(0.9 * vmem_cap)))
        out_flat = pl.pallas_call(
            functools.partial(_embed_dma_gather_kernel, unroll=unroll),
            out_shape=jax.ShapeDtypeStruct((N, D), embed_table.dtype),
            grid_spec=pltpu.PrefetchScalarGridSpec(
                num_scalar_prefetch=1,
                grid=(num_blocks,),
                in_specs=[pl.BlockSpec(memory_space=pl.ANY)],
                out_specs=pl.BlockSpec((tb, D), lambda i, ids: (i, 0)),
                scratch_shapes=[pltpu.SemaphoreType.DMA((1,))],
            ),
            compiler_params=pltpu.CompilerParams(
                # Output blocks are disjoint, table is read-only, scratch sems
                # are per-core -> safe to shard across TCs on v7x as well.
                dimension_semantics=("parallel",),
                vmem_limit_bytes=vmem_limit,
            ),
            cost_estimate=cost,
        )(flat_ids, embed_table)

    return out_flat.reshape(*lead_shape, D)


class EmbedderPallas:
    """Mirror of the PyTorch Embedder module (nn.Embedding(vocab_size, d_model))."""

    def __init__(self, vocab_size, d_model, key, dtype=jnp.float32):
        self.d_model = d_model
        self.vocab_size = vocab_size
        # nn.Embedding default init: N(0, 1).
        self.weight = jax.random.normal(key, (vocab_size, d_model), dtype=dtype)

    def __call__(self, x_ids):
        return embedder_forward(x_ids, self.weight)


if __name__ == "__main__":
    vocab_size = 32
    d_model = 128   # lane-friendly last dim
    B, S = 2, 8

    key = jax.random.PRNGKey(0)
    k_w, k_x = jax.random.split(key)

    embedder = EmbedderPallas(vocab_size, d_model, k_w)
    x = jax.random.randint(k_x, (B, S), 0, vocab_size, dtype=jnp.int32)

    # Reference: plain JAX gather (same semantics as nn.Embedding forward).
    ref = embedder.weight[x]

    # Path 1: table-resident VMEM gather (auto-selected for this small vocab).
    out = jax.block_until_ready(embedder(x))
    assert out.shape == (B, S, d_model)
    assert jnp.array_equal(out, ref)

    # Path 2: HBM-resident table with per-row DMA gather straight into the
    # output block.
    out_dma = jax.block_until_ready(
        embedder_forward(x, embedder.weight, force_dma_gather=True))
    assert out_dma.shape == (B, S, d_model)
    assert jnp.array_equal(out_dma, ref)

    print("KERNEL_OK")
</pallas_src>

<mosaic_0001>
module attributes {stable_mosaic.version = 11 : i64} {
  func.func @_embed_resident_kernel(%arg0: i32, %arg1: memref<16xi32, #tpu.memory_space<smem>>, %arg2: memref<32x128xf32, #tpu.memory_space<vmem>>, %arg3: memref<16x128xf32, #tpu.memory_space<vmem>>) attributes {dimension_semantics = [#tpu.dimension_semantics<parallel>], iteration_bounds = array<i64: 1>, scalar_prefetch = 1 : i64, scratch_operands = 0 : i64, tpu.core_type = #tpu.core_type<tc>, window_params = [{pipeline_mode = #tpu.pipeline_mode<synchronous>, transform_indices = @transform_0, window_bounds = array<i64: 32, 128>}, {transform_indices = @transform_1, window_bounds = array<i64: 16, 128>}]} {
    %c16_i32 = arith.constant 16 : i32
    %0 = arith.muli %arg0, %c16_i32 : i32
    %c0_i32 = arith.constant 0 : i32
    %c2_i32 = arith.constant 2 : i32
    %1 = arith.addi %c0_i32, %c2_i32 : i32
    %c1_i32 = arith.constant 1 : i32
    scf.for %arg4 = %c0_i32 to %1 step %c1_i32  : i32 {
      %c1_i32_1 = arith.constant 1 : i32
      %2 = arith.muli %arg4, %c1_i32_1 : i32
      %c0_i32_2 = arith.constant 0 : i32
      %3 = arith.addi %c0_i32_2, %2 : i32
      %c8_i32 = arith.constant 8 : i32
      %4 = arith.muli %3, %c8_i32 : i32
      %c0_i32_3 = arith.constant 0 : i32
      %5 = arith.addi %4, %c0_i32_3 : i32
      %6 = arith.addi %0, %5 : i32
      %7 = arith.index_cast %6 : i32 to index
      %8 = memref.load %arg1[%7] : memref<16xi32, #tpu.memory_space<smem>>
      %9 = arith.index_cast %8 : i32 to index
      %c0 = arith.constant 0 : index
      %10 = vector.load %arg2[%9, %c0] : memref<32x128xf32, #tpu.memory_space<vmem>>, vector<1x128xf32>
      %11 = arith.index_cast %5 : i32 to index
      %c0_4 = arith.constant 0 : index
      %12 = vector.load %arg3[%11, %c0_4] : memref<16x128xf32, #tpu.memory_space<vmem>>, vector<1x128xf32>
      tpu.vector_store %arg3[%11, %c0_4], %10 {strides = array<i32>} : memref<16x128xf32, #tpu.memory_space<vmem>>, vector<1x128xf32>,
      %c1_i32_5 = arith.constant 1 : i32
      %13 = arith.addi %4, %c1_i32_5 : i32
      %14 = arith.addi %0, %13 : i32
      %15 = arith.index_cast %14 : i32 to index
      %16 = memref.load %arg1[%15] : memref<16xi32, #tpu.memory_space<smem>>
      %17 = arith.index_cast %16 : i32 to index
      %c0_6 = arith.constant 0 : index
      %18 = vector.load %arg2[%17, %c0_6] : memref<32x128xf32, #tpu.memory_space<vmem>>, vector<1x128xf32>
      %19 = arith.index_cast %13 : i32 to index
      %c0_7 = arith.constant 0 : index
      %20 = vector.load %arg3[%19, %c0_7] : memref<16x128xf32, #tpu.memory_space<vmem>>, vector<1x128xf32>
      tpu.vector_store %arg3[%19, %c0_7], %18 {strides = array<i32>} : memref<16x128xf32, #tpu.memory_space<vmem>>, vector<1x128xf32>,
      %c2_i32_8 = arith.constant 2 : i32
      %21 = arith.addi %4, %c2_i32_8 : i32
      %22 = arith.addi %0, %21 : i32
      %23 = arith.index_cast %22 : i32 to index
      %24 = memref.load %arg1[%23] : memref<16xi32, #tpu.memory_space<smem>>
      %25 = arith.index_cast %24 : i32 to index
      %c0_9 = arith.constant 0 : index
      %26 = vector.load %arg2[%25, %c0_9] : memref<32x128xf32, #tpu.memory_space<vmem>>, vector<1x128xf32>
      %27 = arith.index_cast %21 : i32 to index
      %c0_10 = arith.constant 0 : index
      %28 = vector.load %arg3[%27, %c0_10] : memref<16x128xf32, #tpu.memory_space<vmem>>, vector<1x128xf32>
      tpu.vector_store %arg3[%27, %c0_10], %26 {strides = array<i32>} : memref<16x128xf32, #tpu.memory_space<vmem>>, vector<1x128xf32>,
      %c3_i32 = arith.constant 3 : i32
      %29 = arith.addi %4, %c3_i32 : i32
      %30 = arith.addi %0, %29 : i32
      %31 = arith.index_cast %30 : i32 to index
      %32 = memref.load %arg1[%31] : memref<16xi32, #tpu.memory_space<smem>>
      %33 = arith.index_cast %32 : i32 to index
      %c0_11 = arith.constant 0 : index
      %34 = vector.load %arg2[%33, %c0_11] : memref<32x128xf32, #tpu.memory_space<vmem>>, vector<1x128xf32>
      %35 = arith.index_cast %29 : i32 to index
      %c0_12 = arith.constant 0 : index
      %36 = vector.load %arg3[%35, %c0_12] : memref<16x128xf32, #tpu.memory_space<vmem>>, vector<1x128xf32>
      tpu.vector_store %arg3[%35, %c0_12], %34 {strides = array<i32>} : memref<16x128xf32, #tpu.memory_space<vmem>>, vector<1x128xf32>,
      %c4_i32 = arith.constant 4 : i32
      %37 = arith.addi %4, %c4_i32 : i32
      %38 = arith.addi %0, %37 : i32
      %39 = arith.index_cast %38 : i32 to index
      %40 = memref.load %arg1[%39] : memref<16xi32, #tpu.memory_space<smem>>
      %41 = arith.index_cast %40 : i32 to index
      %c0_13 = arith.constant 0 : index
      %42 = vector.load %arg2[%41, %c0_13] : memref<32x128xf32, #tpu.memory_space<vmem>>, vector<1x128xf32>
      %43 = arith.index_cast %37 : i32 to index
      %c0_14 = arith.constant 0 : index
      %44 = vector.load %arg3[%43, %c0_14] : memref<16x128xf32, #tpu.memory_space<vmem>>, vector<1x128xf32>
      tpu.vector_store %arg3[%43, %c0_14], %42 {strides = array<i32>} : memref<16x128xf32, #tpu.memory_space<vmem>>, vector<1x128xf32>,
      %c5_i32 = arith.constant 5 : i32
      %45 = arith.addi %4, %c5_i32 : i32
      %46 = arith.addi %0, %45 : i32
      %47 = arith.index_cast %46 : i32 to index
      %48 = memref.load %arg1[%47] : memref<16xi32, #tpu.memory_space<smem>>
      %49 = arith.index_cast %48 : i32 to index
      %c0_15 = arith.constant 0 : index
      %50 = vector.load %arg2[%49, %c0_15] : memref<32x128xf32, #tpu.memory_space<vmem>>, vector<1x128xf32>
      %51 = arith.index_cast %45 : i32 to index
      %c0_16 = arith.constant 0 : index
      %52 = vector.load %arg3[%51, %c0_16] : memref<16x128xf32, #tpu.memory_space<vmem>>, vector<1x128xf32>
      tpu.vector_store %arg3[%51, %c0_16], %50 {strides = array<i32>} : memref<16x128xf32, #tpu.memory_space<vmem>>, vector<1x128xf32>,
      %c6_i32 = arith.constant 6 : i32
      %53 = arith.addi %4, %c6_i32 : i32
      %54 = arith.addi %0, %53 : i32
      %55 = arith.index_cast %54 : i32 to index
      %56 = memref.load %arg1[%55] : memref<16xi32, #tpu.memory_space<smem>>
      %57 = arith.index_cast %56 : i32 to index
      %c0_17 = arith.constant 0 : index
      %58 = vector.load %arg2[%57, %c0_17] : memref<32x128xf32, #tpu.memory_space<vmem>>, vector<1x128xf32>
      %59 = arith.index_cast %53 : i32 to index
      %c0_18 = arith.constant 0 : index
      %60 = vector.load %arg3[%59, %c0_18] : memref<16x128xf32, #tpu.memory_space<vmem>>, vector<1x128xf32>
      tpu.vector_store %arg3[%59, %c0_18], %58 {strides = array<i32>} : memref<16x128xf32, #tpu.memory_space<vmem>>, vector<1x128xf32>,
      %c7_i32 = arith.constant 7 : i32
      %61 = arith.addi %4, %c7_i32 : i32
      %62 = arith.addi %0, %61 : i32
      %63 = arith.index_cast %62 : i32 to index
      %64 = memref.load %arg1[%63] : memref<16xi32, #tpu.memory_space<smem>>
      %65 = arith.index_cast %64 : i32 to index
      %c0_19 = arith.constant 0 : index
      %66 = vector.load %arg2[%65, %c0_19] : memref<32x128xf32, #tpu.memory_space<vmem>>, vector<1x128xf32>
      %67 = arith.index_cast %61 : i32 to index
      %c0_20 = arith.constant 0 : index
      %68 = vector.load %arg3[%67, %c0_20] : memref<16x128xf32, #tpu.memory_space<vmem>>, vector<1x128xf32>
      tpu.vector_store %arg3[%67, %c0_20], %66 {strides = array<i32>} : memref<16x128xf32, #tpu.memory_space<vmem>>, vector<1x128xf32>,
    }
    %c2_i32_0 = arith.constant 2 : i32
    return
  }
  func.func @transform_0(%arg0: i32, %arg1: memref<16xi32, #tpu.memory_space<smem>>) -> (i32, i32) {
    %c0_i32 = arith.constant 0 : i32
    %c0_i32_0 = arith.constant 0 : i32
    %c0_i32_1 = arith.constant 0 : i32
    return %c0_i32, %c0_i32_0 : i32, i32
  }
  func.func @transform_1(%arg0: i32, %arg1: memref<16xi32, #tpu.memory_space<smem>>) -> (i32, i32) {
    %c0_i32 = arith.constant 0 : i32
    %c0_i32_0 = arith.constant 0 : i32
    return %arg0, %c0_i32 : i32, i32
  }
}

</mosaic_0001>

<bundles_post_ra>
// kernel: tpu_custom_call.1
= control target key start
LH: loop header
LB: loop body
LE: loop exit
PB: predicated region body
PF: predicated region fallthrough
CT: control target
= control target key end

     0   :  { %s311_s0 = inlined_call_operand.hbm [shape: s32[16], index: 0, kind: input, shape index: {}]   ;;  %s312_s1 = inlined_call_operand.hbm [shape: f32[32,128], index: 1, kind: input, shape index: {}]   ;;  %s313_s2 = inlined_call_operand.hbm [shape: f32[16,128], index: 2, kind: output, shape index: {}]  }
   0x1   :  { %s172_s11 = scalar_lea.hbm %s311_s0, 16 }
   0x2   :  { %p173_p0 = scmp.ne.s32.totalorder %s311_s0, %s172_s11  ;;  %p176_p1 = scmp.lt.u32.totalorder %s172_s11, %s311_s0 }
   0x4   :  { %p178_p2 = pnand %p176_p1, %p173_p0 }
   0x6   :  { %181 = shalt.err (!%p178_p2)  }
   0x7   :  { %s240_s16 = smov [#allocation3]  }
   0x8   :  { %8 = dma.hbm_to_smem %s311_s0, 16, %s240_s16, [#allocation2] }
   0x9   :  { %230 = dma.done.wait [#allocation2], 16 }
   0xa   :  { %231 = vsyncadd [#allocation2], 4294967280 }
   0xb   :  { %10 = sfence }
   0xc   :  { %11 = vsyncpa [#allocation5], 0 }
   0xd   :  { %12 = vsyncpa [#allocation6], 0  ;;  %s241_s19 = smov [#allocation4]   ;;  %s182_s23 = scalar_lea.hbm %s312_s1, 512 }
   0xe   :  { %s18_s20 = sshll.u32 %s241_s19, 4  ;;  %p183_p3 = scmp.ne.s32.totalorder %s312_s1, %s182_s23  ;;  %s19_s20 = int_to_ptr.vmem [resolvable:$true] %s18_s20 }
   0xf   :  { %p186_p4 = scmp.lt.u32.totalorder %s182_s23, %s312_s1 }
  0x11   :  { %p188_p5 = pnand %p186_p4, %p183_p3 }
  0x13   :  { %191 = shalt.err (!%p188_p5)
}
  0x14   :  { %s192_s0 = scalar_lea.vmem %s19_s20, 512  ;;  %p197_p7 = scmp.lt.s32.totalorder %s19_s20, %s19_s20 }
  0x15   :  { %p193_p6 = scmp.ne.s32.totalorder %s19_s20, %s192_s0  ;;  %p198_p8 = scmp.lt.s32.totalorder %s192_s0, %s192_s0 }
  0x17   :  { %p199_p9 = por %p198_p8, %p197_p7 }
  0x19   :  { %p200_p10 = pnand %p199_p9, %p193_p6 }
  0x1b   :  { %203 = shalt.err (!%p200_p10)
}
  0x1c   :  { %s242_s28 = smov 128   ;;  %s243_s29 = smov 8  }
  0x1d   :  { %24 = dma.hbm_to_vmem [thread:$0]  %s312_s1, 512, %s19_s20, [#allocation5], %s242_s28, %s242_s28, %s243_s29  }
  0x1e   :  { %232 = dma.done.wait [#allocation5], 512  }
  0x1f   :  { %233 = vsyncadd [#allocation5], 4294966784  ;;  %s287_s4 = smov 0  }
  0x20 LB: > { %s144_s5 = sshll.u32 %s238_s4, 3  ;;  %s34_s4 = sadd.s32 1, %s238_s4   ;;  %s238_s4 = sphi %s287_s4, %s34_s4  }
  0x21   : > { %s37_s6 = sld [smem:[#allocation3 + %s144_s5]]  ;;  %s42_s7 = sadd.s32 1, %s144_s5 }
  0x22   : > { %s49_s8 = sadd.s32 2, %s144_s5  ;;  %s44_s9 = sld [smem:[#allocation3 + %s42_s7]] }
  0x23   : > { %s51_s10 = sld [smem:[#allocation3 + %s49_s8]]  ;;  %s56_s11 = sadd.s32 3, %s144_s5 }
  0x24   : > { %s63_s12 = sadd.s32 4, %s144_s5  ;;  %s58_s13 = sld [smem:[#allocation3 + %s56_s11]] }
  0x25   : > { %s65_s1 = sld [smem:[#allocation3 + %s63_s12]]  ;;  %s70_s14 = sadd.s32 5, %s144_s5 }
  0x26   : > { %s77_s15 = sadd.s32 6, %s144_s5  ;;  %s72_s16 = sld [smem:[#allocation3 + %s70_s14]] }
  0x27   : > { %s38_s17 = scalar_lea.vmem [#allocation4], %s37_s6  ;;  %s79_s18 = sld [smem:[#allocation3 + %s77_s15]] }
  0x28   : > { %v39_v0 = vld [vmem:[%s38_s17] sm:$0x1]  ;;  %s84_s19 = sadd.s32 7, %s144_s5  ;;  %s40_s20 = scalar_lea.vmem [#allocation7], %s144_s5 }
  0x29   : > { %41 = vst [vmem:[%s40_s20] sm:$0x1] %v39_v0  ;;  %s45_s21 = scalar_lea.vmem [#allocation4], %s44_s9  ;;  %s52_s22 = scalar_lea.vmem [#allocation4], %s51_s10 }
  0x2a   : > { %v46_v1 = vld [vmem:[%s45_s21] sm:$0x1]  ;;  %s86_s23 = sld [smem:[#allocation3 + %s84_s19]]  ;;  %s59_s24 = scalar_lea.vmem [#allocation4], %s58_s13 }
  0x2b   : > { %v53_v2 = vld [vmem:[%s52_s22] sm:$0x1]  ;;  %146 = vst [vmem:[%s40_s20 + $0x1] sm:$0x1] %v46_v1  ;;  %s66_s25 = scalar_lea.vmem [#allocation4], %s65_s1  ;;  %p31_p11 = scmp.ge.s32.totalorder %s34_s4, 2  }
  0x2c   : > { %148 = vst [vmem:[%s40_s20 + $0x2] sm:$0x1] %v53_v2  ;;  %v60_v3 = vld [vmem:[%s59_s24] sm:$0x1]  ;;  %s73_s26 = scalar_lea.vmem [#allocation4], %s72_s16  ;;  %s244_s30 = smov (%p31_p11), [#allocation7]  }
  0x2d   : > { %v67_v4 = vld [vmem:[%s66_s25] sm:$0x1]  ;;  %150 = vst [vmem:[%s40_s20 + $0x3] sm:$0x1] %v60_v3  ;;  %s80_s27 = scalar_lea.vmem [#allocation4], %s79_s18  ;;  %33 = sbr.rel (!%p31_p11) target bundleno = 32 (0x20), region = 51 }
  0x2e   : > { %152 = vst [vmem:[%s40_s20 + $0x4] sm:$0x1] %v67_v4  ;;  %v74_v5 = vld [vmem:[%s73_s26] sm:$0x1]  ;;  %s96_s3 = sshll.u32 (%p31_p11), %s244_s30, 4  ;;  %s97_s3 = int_to_ptr.vmem [resolvable:$true] %s96_s3 }
  0x2f   : > { %154 = vst [vmem:[%s40_s20 + $0x5] sm:$0x1] %v74_v5  ;;  %v81_v6 = vld [vmem:[%s80_s27] sm:$0x1]  ;;  %s204_s5 = scalar_lea.vmem (%p31_p11), %s97_s3, 256  ;;  %p209_p13 = scmp.lt.s32.totalorder (%p31_p11), %s97_s3, %s97_s3 }
  0x30   : > { %156 = vst [vmem:[%s40_s20 + $0x6] sm:$0x1] %v81_v6  ;;  %s87_s0 = scalar_lea.vmem [#allocation4], %s86_s23  ;;  %p205_p12 = scmp.ne.s32.totalorder (%p31_p11), %s97_s3, %s204_s5 }
  0x31   : > { %v88_v7 = vld [vmem:[%s87_s0] sm:$0x1]  ;;  %p210_p0 = scmp.lt.s32.totalorder (%p31_p11), %s204_s5, %s204_s5 }
  0x32   : > { %158 = vst [vmem:[%s40_s20 + $0x7] sm:$0x1] %v88_v7 }
  0x33   :  { %p211_p1 = por (%p31_p11), %p210_p0, %p209_p13 }
  0x35   :  { %p212_p2 = pnand %p211_p1, %p205_p12 }
  0x37   :  { %215 = shalt.err (!%p212_p2)
}
  0x38   :  { %s216_s8 = scalar_lea.hbm %s313_s2, 256 }
  0x39   :  { %p217_p3 = scmp.ne.s32.totalorder %s313_s2, %s216_s8  ;;  %p220_p4 = scmp.lt.u32.totalorder %s216_s8, %s313_s2 }
  0x3b   :  { %p222_p5 = pnand %p220_p4, %p217_p3 }
  0x3d   :  { %225 = shalt.err (!%p222_p5)
}
  0x3e   :  { %102 = dma.vmem_to_hbm [thread:$0]  %s97_s3, 256, %s313_s2, [#allocation6], %s242_s28, %s242_s28, %s243_s29  }
  0x3f   :  { %234 = dma.done.wait [#allocation6], 256  }
  0x40   :  { %235 = vsyncadd [#allocation6], 4294967040 }
  0x41   :  { %106 = vsyncpa [#allocation5], 1 }
  0x42   :  { %107 = vsyncpa [#allocation6], 1 }

</bundles_post_ra>
